<compile_context>
chip_gen: v7x
topology: tpu7x:2x2x1
jax: 0.10.0
libtpu: 0.0.40
codegen_flags: <defaults>
</compile_context>

<pallas_src>
import functools
import math
from collections import OrderedDict

import jax
import jax.numpy as jnp
from jax.experimental import pallas as pl
from jax.experimental.pallas import tpu as pltpu

EPS = 1e-12
LANES = 128          # vreg lane width
MAX_TILE_T = 2048    # time-tile cap (bytes per stream block stay tiny: S*2048*4)


def _round_up(x, m):
    return ((x + m - 1) // m) * m


def _metrics_kernel(T_true,
                    mix_ref, est_ref, tgt_ref,
                    sisdr_mix_ref, sdr_mix_ref, sisdr_est_ref, sdr_est_ref,
                    mt_acc, et_acc, tt_acc, mm_acc, ee_acc):
    """Fused accumulation of <mix,tgt>, <est,tgt>, ||tgt||^2, ||mix||^2, ||est||^2
    over time tiles, finalizing SI-SDR and SDR for both operand pairs."""
    k = pl.program_id(1)
    n_k = pl.num_programs(1)
    S = est_ref.shape[1]
    tile_t = est_ref.shape[2]
    n_chunks = tile_t // LANES
    ragged = (T_true % tile_t) != 0   # static python bool (trace-time)

    @pl.when(k == 0)
    def _init():
        mt_acc[...] = jnp.zeros_like(mt_acc)
        et_acc[...] = jnp.zeros_like(et_acc)
        tt_acc[...] = jnp.zeros_like(tt_acc)
        mm_acc[...] = jnp.zeros_like(mm_acc)
        ee_acc[...] = jnp.zeros_like(ee_acc)

    if ragged:
        lane_idx = jax.lax.broadcasted_iota(jnp.int32, (1, LANES), 1)
        tile_base = k * tile_t

    # Lane-resident partial sums kept in vregs across the (unrolled) chunk loop;
    # accumulator scratch is touched only once per grid step.
    mt_p = jnp.zeros((S, LANES), jnp.float32)
    et_p = jnp.zeros((S, LANES), jnp.float32)
    tt_p = jnp.zeros((S, LANES), jnp.float32)
    mm_p = jnp.zeros((1, LANES), jnp.float32)
    ee_p = jnp.zeros((S, LANES), jnp.float32)

    for c in range(n_chunks):
        lo = c * LANES
        m = mix_ref[0, :, lo:lo + LANES]   # (1, LANES) -- broadcast over sources
        e = est_ref[0, :, lo:lo + LANES]   # (S, LANES)
        t = tgt_ref[0, :, lo:lo + LANES]   # (S, LANES)
        if ragged:
            # Zero out the overhang of the last (partial) tile; zeros are
            # exactly neutral for all accumulated inner products.
            valid = (tile_base + lo + lane_idx) < T_true   # (1, LANES)
            m = jnp.where(valid, m, 0.0)
            e = jnp.where(valid, e, 0.0)
            t = jnp.where(valid, t, 0.0)
        mt_p = mt_p + m * t
        et_p = et_p + e * t
        tt_p = tt_p + t * t
        mm_p = mm_p + m * m
        ee_p = ee_p + e * e

    mt_acc[...] += mt_p
    et_acc[...] += et_p
    tt_acc[...] += tt_p
    mm_acc[...] += mm_p
    ee_acc[...] += ee_p

    @pl.when(k == n_k - 1)
    def _finalize():
        mt = jnp.sum(mt_acc[...], axis=-1, keepdims=True)   # (S, 1)
        et = jnp.sum(et_acc[...], axis=-1, keepdims=True)   # (S, 1)
        tt = jnp.sum(tt_acc[...], axis=-1, keepdims=True)   # (S, 1)
        mm = jnp.sum(mm_acc[...], axis=-1, keepdims=True)   # (1, 1)
        ee = jnp.sum(ee_acc[...], axis=-1, keepdims=True)   # (S, 1)
        inv_ln10 = 1.0 / math.log(10.0)

        def _si_sdr(xt, tt_, xx):
            alpha = xt / (tt_ + EPS)
            proj = alpha * alpha * tt_
            num = proj + EPS
            den = proj - 2.0 * alpha * xt + xx + EPS
            return 10.0 * inv_ln10 * jnp.log(num / den)

        def _sdr(xt, tt_, xx):
            num = tt_ + EPS
            den = tt_ - 2.0 * xt + xx + EPS
            return 10.0 * inv_ln10 * jnp.log(num / den)

        sisdr_mix_ref[...] = _si_sdr(mt, tt, mm)[None]   # (1, S, 1)
        sdr_mix_ref[...] = _sdr(mt, tt, mm)[None]
        sisdr_est_ref[...] = _si_sdr(et, tt, ee)[None]
        sdr_est_ref[...] = _sdr(et, tt, ee)[None]


def _fused_metrics(mixture, estimated_sources, sources, *, max_tile_t=MAX_TILE_T):
    """mixture (B,T), estimated_sources/sources (B,S,T)
    -> (sisdr_mix, sdr_mix, sisdr_est, sdr_est), each (B, S) float32."""
    B, S, T = sources.shape
    mix3 = mixture.reshape(B, 1, T).astype(jnp.float32)   # metadata reshape only
    est = estimated_sources.astype(jnp.float32)
    tgt = sources.astype(jnp.float32)

    tile_t = min(_round_up(T, LANES), max_tile_t)   # large, lane-aligned tile
    n_k = -(-T // tile_t)                           # ceil-div; last tile masked

    kernel = functools.partial(_metrics_kernel, T)

    out_sds = jax.ShapeDtypeStruct((B, S, 1), jnp.float32)
    out_spec = pl.BlockSpec((1, S, 1), lambda b, k: (b, 0, 0))

    outs = pl.pallas_call(
        kernel,
        out_shape=(out_sds,) * 4,
        grid_spec=pltpu.PrefetchScalarGridSpec(
            num_scalar_prefetch=0,
            grid=(B, n_k),
            in_specs=[
                pl.BlockSpec((1, 1, tile_t), lambda b, k: (b, 0, k)),  # mixture
                pl.BlockSpec((1, S, tile_t), lambda b, k: (b, 0, k)),  # estimate
                pl.BlockSpec((1, S, tile_t), lambda b, k: (b, 0, k)),  # target
            ],
            out_specs=(out_spec,) * 4,
            scratch_shapes=[
                pltpu.VMEM((S, LANES), jnp.float32),  # <mix, tgt>
                pltpu.VMEM((S, LANES), jnp.float32),  # <est, tgt>
                pltpu.VMEM((S, LANES), jnp.float32),  # ||tgt||^2
                pltpu.VMEM((1, LANES), jnp.float32),  # ||mix||^2
                pltpu.VMEM((S, LANES), jnp.float32),  # ||est||^2
            ],
        ),
        compiler_params=pltpu.CompilerParams(
            # batch axis parallel (megacore on v7x), time axis is the reduction
            dimension_semantics=("parallel", "arbitrary"),
        ),
    )(mix3, est, tgt)

    sisdr_mix, sdr_mix, sisdr_est, sdr_est = [o[..., 0] for o in outs]
    return sisdr_mix, sdr_mix, sisdr_est, sdr_est


def metrics_forward(mixture, estimated_sources, sources, batch_mean=True):
    """JAX/Pallas equivalent of Metrics.forward with metrics = {sisdr, sdr}.

    mixture:            (B, T)
    estimated_sources:  (B, S, T)
    sources:            (B, S, T)
    Returns OrderedDict {key: (S,) if batch_mean else (B, S)} with
    metric(mixture, sources) - metric(estimated_sources, sources).
    """
    sisdr_mix, sdr_mix, sisdr_est, sdr_est = _fused_metrics(
        mixture, estimated_sources, sources)

    def reduce(v):
        return jnp.mean(v, axis=0) if batch_mean else v

    # TODO(synk): generic nn.ModuleDict dispatch is not translatable; the metric
    # dict is instantiated concretely with SI-SDR and SDR (the recipe's metrics).
    results = OrderedDict()
    results["sisdr"] = reduce(sisdr_mix) - reduce(sisdr_est)
    results["sdr"] = reduce(sdr_mix) - reduce(sdr_est)
    return results


def _metrics_reference(mixture, estimated_sources, sources, batch_mean=True):
    """Pure-jnp reference for validation."""
    x_mix = jnp.broadcast_to(mixture[:, None, :], sources.shape).astype(jnp.float32)
    est = estimated_sources.astype(jnp.float32)
    tgt = sources.astype(jnp.float32)

    def inner(x, t):
        return (jnp.sum(x * t, axis=-1), jnp.sum(t * t, axis=-1),
                jnp.sum(x * x, axis=-1))

    def si_sdr(x, t):
        xt, tt, xx = inner(x, t)
        alpha = xt / (tt + EPS)
        proj = alpha * alpha * tt
        return 10.0 * jnp.log10((proj + EPS) / (proj - 2.0 * alpha * xt + xx + EPS))

    def sdr(x, t):
        xt, tt, xx = inner(x, t)
        return 10.0 * jnp.log10((tt + EPS) / (tt - 2.0 * xt + xx + EPS))

    results = OrderedDict()
    for name, fn in (("sisdr", si_sdr), ("sdr", sdr)):
        v = fn(x_mix, tgt) - fn(est, tgt)
        results[name] = jnp.mean(v, axis=0) if batch_mean else v
    return results


if __name__ == "__main__":
    key = jax.random.PRNGKey(0)

    # Case 1: T divisible by the time tile (single grid step over time).
    B, S, T = 2, 3, 1024
    k1, k2 = jax.random.split(key)
    sources = jax.random.normal(k1, (B, S, T), dtype=jnp.float32)
    noise = jax.random.normal(k2, (B, S, T), dtype=jnp.float32)
    estimated_sources = sources + 0.1 * noise
    mixture = jnp.sum(sources, axis=1)                 # (B, T)

    out = metrics_forward(mixture, estimated_sources, sources, batch_mean=True)
    ref = _metrics_reference(mixture, estimated_sources, sources, batch_mean=True)
    for name, v in out.items():
        v = jax.block_until_ready(v)
        assert v.shape == (S,), v.shape
        assert bool(jnp.all(jnp.isfinite(v)))
        assert bool(jnp.allclose(v, ref[name], rtol=1e-3, atol=1e-3)), name

    # Case 2: ragged T (not a multiple of the tile) -> masked final tile,
    # multiple accumulation steps, batch_mean=False path.
    B2, S2, T2 = 2, 2, 2500
    k3, k4 = jax.random.split(k2)
    sources2 = jax.random.normal(k3, (B2, S2, T2), dtype=jnp.float32)
    estimated2 = sources2 + 0.2 * jax.random.normal(k4, (B2, S2, T2), dtype=jnp.float32)
    mixture2 = jnp.sum(sources2, axis=1)

    out2 = metrics_forward(mixture2, estimated2, sources2, batch_mean=False)
    ref2 = _metrics_reference(mixture2, estimated2, sources2, batch_mean=False)
    for name, v in out2.items():
        v = jax.block_until_ready(v)
        assert v.shape == (B2, S2), v.shape
        assert bool(jnp.all(jnp.isfinite(v)))
        assert bool(jnp.allclose(v, ref2[name], rtol=1e-3, atol=1e-3)), name

    print("KERNEL_OK")
</pallas_src>

<mosaic_0001>
module attributes {stable_mosaic.version = 11 : i64} {
  func.func @_metrics_kernel(%arg0: i32, %arg1: i32, %arg2: memref<1x1x1024xf32, #tpu.memory_space<vmem>>, %arg3: memref<1x3x1024xf32, #tpu.memory_space<vmem>>, %arg4: memref<1x3x1024xf32, #tpu.memory_space<vmem>>, %arg5: memref<1x3x1xf32, #tpu.memory_space<vmem>>, %arg6: memref<1x3x1xf32, #tpu.memory_space<vmem>>, %arg7: memref<1x3x1xf32, #tpu.memory_space<vmem>>, %arg8: memref<1x3x1xf32, #tpu.memory_space<vmem>>, %arg9: memref<3x128xf32, #tpu.memory_space<vmem>>, %arg10: memref<3x128xf32, #tpu.memory_space<vmem>>, %arg11: memref<3x128xf32, #tpu.memory_space<vmem>>, %arg12: memref<1x128xf32, #tpu.memory_space<vmem>>, %arg13: memref<3x128xf32, #tpu.memory_space<vmem>>) attributes {dimension_semantics = [#tpu.dimension_semantics<parallel>, #tpu.dimension_semantics<arbitrary>], iteration_bounds = array<i64: 2, 1>, scalar_prefetch = 0 : i64, scratch_operands = 5 : i64, tpu.core_type = #tpu.core_type<tc>, window_params = [{transform_indices = @transform_0, window_bounds = array<i64: 1, 1, 1024>}, {transform_indices = @transform_1, window_bounds = array<i64: 1, 3, 1024>}, {transform_indices = @transform_2, window_bounds = array<i64: 1, 3, 1024>}, {transform_indices = @transform_3, window_bounds = array<i64: 1, 3, 1>}, {transform_indices = @transform_4, window_bounds = array<i64: 1, 3, 1>}, {transform_indices = @transform_5, window_bounds = array<i64: 1, 3, 1>}, {transform_indices = @transform_6, window_bounds = array<i64: 1, 3, 1>}]} {
    %c0_i32 = arith.constant 0 : i32
    %0 = arith.cmpi eq, %arg1, %c0_i32 : i32
    %1 = arith.extui %0 : i1 to i32
    %c0_i32_0 = arith.constant 0 : i32
    %2 = arith.cmpi ne, %1, %c0_i32_0 : i32
    scf.if %2 {
      %cst_91 = arith.constant 0.000000e+00 : f32
      %162 = vector.broadcast %cst_91 : f32 to vector<3x128xf32>
      %c0_92 = arith.constant 0 : index
      %c0_93 = arith.constant 0 : index
      %163 = vector.load %arg9[%c0_92, %c0_93] : memref<3x128xf32, #tpu.memory_space<vmem>>, vector<3x128xf32>
      tpu.vector_store %arg9[%c0_92, %c0_93], %162 {strides = array<i32>} : memref<3x128xf32, #tpu.memory_space<vmem>>, vector<3x128xf32>,
      %cst_94 = arith.constant 0.000000e+00 : f32
      %164 = vector.broadcast %cst_94 : f32 to vector<3x128xf32>
      %c0_95 = arith.constant 0 : index
      %c0_96 = arith.constant 0 : index
      %165 = vector.load %arg10[%c0_95, %c0_96] : memref<3x128xf32, #tpu.memory_space<vmem>>, vector<3x128xf32>
      tpu.vector_store %arg10[%c0_95, %c0_96], %164 {strides = array<i32>} : memref<3x128xf32, #tpu.memory_space<vmem>>, vector<3x128xf32>,
      %cst_97 = arith.constant 0.000000e+00 : f32
      %166 = vector.broadcast %cst_97 : f32 to vector<3x128xf32>
      %c0_98 = arith.constant 0 : index
      %c0_99 = arith.constant 0 : index
      %167 = vector.load %arg11[%c0_98, %c0_99] : memref<3x128xf32, #tpu.memory_space<vmem>>, vector<3x128xf32>
      tpu.vector_store %arg11[%c0_98, %c0_99], %166 {strides = array<i32>} : memref<3x128xf32, #tpu.memory_space<vmem>>, vector<3x128xf32>,
      %cst_100 = arith.constant 0.000000e+00 : f32
      %168 = vector.broadcast %cst_100 : f32 to vector<1x128xf32>
      %c0_101 = arith.constant 0 : index
      %c0_102 = arith.constant 0 : index
      %169 = vector.load %arg12[%c0_101, %c0_102] : memref<1x128xf32, #tpu.memory_space<vmem>>, vector<1x128xf32>
      tpu.vector_store %arg12[%c0_101, %c0_102], %168 {strides = array<i32>} : memref<1x128xf32, #tpu.memory_space<vmem>>, vector<1x128xf32>,
      %cst_103 = arith.constant 0.000000e+00 : f32
      %170 = vector.broadcast %cst_103 : f32 to vector<3x128xf32>
      %c0_104 = arith.constant 0 : index
      %c0_105 = arith.constant 0 : index
      %171 = vector.load %arg13[%c0_104, %c0_105] : memref<3x128xf32, #tpu.memory_space<vmem>>, vector<3x128xf32>
      tpu.vector_store %arg13[%c0_104, %c0_105], %170 {strides = array<i32>} : memref<3x128xf32, #tpu.memory_space<vmem>>, vector<3x128xf32>,
    } else {
    }
    %cst = arith.constant 0.000000e+00 : f32
    %3 = vector.broadcast %cst : f32 to vector<3x128xf32>
    %cst_1 = arith.constant 0.000000e+00 : f32
    %4 = vector.broadcast %cst_1 : f32 to vector<3x128xf32>
    %cst_2 = arith.constant 0.000000e+00 : f32
    %5 = vector.broadcast %cst_2 : f32 to vector<3x128xf32>
    %cst_3 = arith.constant 0.000000e+00 : f32
    %6 = vector.broadcast %cst_3 : f32 to vector<1x128xf32>
    %cst_4 = arith.constant 0.000000e+00 : f32
    %7 = vector.broadcast %cst_4 : f32 to vector<3x128xf32>
    %c0 = arith.constant 0 : index
    %c0_5 = arith.constant 0 : index
    %c0_6 = arith.constant 0 : index
    %8 = vector.load %arg2[%c0, %c0_5, %c0_6] : memref<1x1x1024xf32, #tpu.memory_space<vmem>>, vector<1x1x128xf32>
    %9 = vector.shape_cast %8 : vector<1x1x128xf32> to vector<1x128xf32>
    %c0_7 = arith.constant 0 : index
    %c0_8 = arith.constant 0 : index
    %c0_9 = arith.constant 0 : index
    %10 = vector.load %arg3[%c0_7, %c0_8, %c0_9] : memref<1x3x1024xf32, #tpu.memory_space<vmem>>, vector<1x3x128xf32>
    %11 = vector.shape_cast %10 : vector<1x3x128xf32> to vector<3x128xf32>
    %c0_10 = arith.constant 0 : index
    %c0_11 = arith.constant 0 : index
    %c0_12 = arith.constant 0 : index
    %12 = vector.load %arg4[%c0_10, %c0_11, %c0_12] : memref<1x3x1024xf32, #tpu.memory_space<vmem>>, vector<1x3x128xf32>
    %13 = vector.shape_cast %12 : vector<1x3x128xf32> to vector<3x128xf32>
    %14 = vector.broadcast %9 : vector<1x128xf32> to vector<3x128xf32>
    %15 = arith.mulf %14, %13 : vector<3x128xf32>
    %16 = arith.addf %3, %15 : vector<3x128xf32>
    %17 = arith.mulf %11, %13 : vector<3x128xf32>
    %18 = arith.addf %4, %17 : vector<3x128xf32>
    %19 = arith.mulf %13, %13 : vector<3x128xf32>
    %20 = arith.addf %5, %19 : vector<3x128xf32>
    %21 = arith.mulf %9, %9 : vector<1x128xf32>
    %22 = arith.addf %6, %21 : vector<1x128xf32>
    %23 = arith.mulf %11, %11 : vector<3x128xf32>
    %24 = arith.addf %7, %23 : vector<3x128xf32>
    %c0_13 = arith.constant 0 : index
    %c0_14 = arith.constant 0 : index
    %c128 = arith.constant 128 : index
    %25 = vector.load %arg2[%c0_13, %c0_14, %c128] : memref<1x1x1024xf32, #tpu.memory_space<vmem>>, vector<1x1x128xf32>
    %26 = vector.shape_cast %25 : vector<1x1x128xf32> to vector<1x128xf32>
    %c0_15 = arith.constant 0 : index
    %c0_16 = arith.constant 0 : index
    %c128_17 = arith.constant 128 : index
    %27 = vector.load %arg3[%c0_15, %c0_16, %c128_17] : memref<1x3x1024xf32, #tpu.memory_space<vmem>>, vector<1x3x128xf32>
    %28 = vector.shape_cast %27 : vector<1x3x128xf32> to vector<3x128xf32>
    %c0_18 = arith.constant 0 : index
    %c0_19 = arith.constant 0 : index
    %c128_20 = arith.constant 128 : index
    %29 = vector.load %arg4[%c0_18, %c0_19, %c128_20] : memref<1x3x1024xf32, #tpu.memory_space<vmem>>, vector<1x3x128xf32>
    %30 = vector.shape_cast %29 : vector<1x3x128xf32> to vector<3x128xf32>
    %31 = vector.broadcast %26 : vector<1x128xf32> to vector<3x128xf32>
    %32 = arith.mulf %31, %30 : vector<3x128xf32>
    %33 = arith.addf %16, %32 : vector<3x128xf32>
    %34 = arith.mulf %28, %30 : vector<3x128xf32>
    %35 = arith.addf %18, %34 : vector<3x128xf32>
    %36 = arith.mulf %30, %30 : vector<3x128xf32>
    %37 = arith.addf %20, %36 : vector<3x128xf32>
    %38 = arith.mulf %26, %26 : vector<1x128xf32>
    %39 = arith.addf %22, %38 : vector<1x128xf32>
    %40 = arith.mulf %28, %28 : vector<3x128xf32>
    %41 = arith.addf %24, %40 : vector<3x128xf32>
    %c0_21 = arith.constant 0 : index
    %c0_22 = arith.constant 0 : index
    %c256 = arith.constant 256 : index
    %42 = vector.load %arg2[%c0_21, %c0_22, %c256] : memref<1x1x1024xf32, #tpu.memory_space<vmem>>, vector<1x1x128xf32>
    %43 = vector.shape_cast %42 : vector<1x1x128xf32> to vector<1x128xf32>
    %c0_23 = arith.constant 0 : index
    %c0_24 = arith.constant 0 : index
    %c256_25 = arith.constant 256 : index
    %44 = vector.load %arg3[%c0_23, %c0_24, %c256_25] : memref<1x3x1024xf32, #tpu.memory_space<vmem>>, vector<1x3x128xf32>
    %45 = vector.shape_cast %44 : vector<1x3x128xf32> to vector<3x128xf32>
    %c0_26 = arith.constant 0 : index
    %c0_27 = arith.constant 0 : index
    %c256_28 = arith.constant 256 : index
    %46 = vector.load %arg4[%c0_26, %c0_27, %c256_28] : memref<1x3x1024xf32, #tpu.memory_space<vmem>>, vector<1x3x128xf32>
    %47 = vector.shape_cast %46 : vector<1x3x128xf32> to vector<3x128xf32>
    %48 = vector.broadcast %43 : vector<1x128xf32> to vector<3x128xf32>
    %49 = arith.mulf %48, %47 : vector<3x128xf32>
    %50 = arith.addf %33, %49 : vector<3x128xf32>
    %51 = arith.mulf %45, %47 : vector<3x128xf32>
    %52 = arith.addf %35, %51 : vector<3x128xf32>
    %53 = arith.mulf %47, %47 : vector<3x128xf32>
    %54 = arith.addf %37, %53 : vector<3x128xf32>
    %55 = arith.mulf %43, %43 : vector<1x128xf32>
    %56 = arith.addf %39, %55 : vector<1x128xf32>
    %57 = arith.mulf %45, %45 : vector<3x128xf32>
    %58 = arith.addf %41, %57 : vector<3x128xf32>
    %c0_29 = arith.constant 0 : index
    %c0_30 = arith.constant 0 : index
    %c384 = arith.constant 384 : index
    %59 = vector.load %arg2[%c0_29, %c0_30, %c384] : memref<1x1x1024xf32, #tpu.memory_space<vmem>>, vector<1x1x128xf32>
    %60 = vector.shape_cast %59 : vector<1x1x128xf32> to vector<1x128xf32>
    %c0_31 = arith.constant 0 : index
    %c0_32 = arith.constant 0 : index
    %c384_33 = arith.constant 384 : index
    %61 = vector.load %arg3[%c0_31, %c0_32, %c384_33] : memref<1x3x1024xf32, #tpu.memory_space<vmem>>, vector<1x3x128xf32>
    %62 = vector.shape_cast %61 : vector<1x3x128xf32> to vector<3x128xf32>
    %c0_34 = arith.constant 0 : index
    %c0_35 = arith.constant 0 : index
    %c384_36 = arith.constant 384 : index
    %63 = vector.load %arg4[%c0_34, %c0_35, %c384_36] : memref<1x3x1024xf32, #tpu.memory_space<vmem>>, vector<1x3x128xf32>
    %64 = vector.shape_cast %63 : vector<1x3x128xf32> to vector<3x128xf32>
    %65 = vector.broadcast %60 : vector<1x128xf32> to vector<3x128xf32>
    %66 = arith.mulf %65, %64 : vector<3x128xf32>
    %67 = arith.addf %50, %66 : vector<3x128xf32>
    %68 = arith.mulf %62, %64 : vector<3x128xf32>
    %69 = arith.addf %52, %68 : vector<3x128xf32>
    %70 = arith.mulf %64, %64 : vector<3x128xf32>
    %71 = arith.addf %54, %70 : vector<3x128xf32>
    %72 = arith.mulf %60, %60 : vector<1x128xf32>
    %73 = arith.addf %56, %72 : vector<1x128xf32>
    %74 = arith.mulf %62, %62 : vector<3x128xf32>
    %75 = arith.addf %58, %74 : vector<3x128xf32>
    %c0_37 = arith.constant 0 : index
    %c0_38 = arith.constant 0 : index
    %c512 = arith.constant 512 : index
    %76 = vector.load %arg2[%c0_37, %c0_38, %c512] : memref<1x1x1024xf32, #tpu.memory_space<vmem>>, vector<1x1x128xf32>
    %77 = vector.shape_cast %76 : vector<1x1x128xf32> to vector<1x128xf32>
    %c0_39 = arith.constant 0 : index
    %c0_40 = arith.constant 0 : index
    %c512_41 = arith.constant 512 : index
    %78 = vector.load %arg3[%c0_39, %c0_40, %c512_41] : memref<1x3x1024xf32, #tpu.memory_space<vmem>>, vector<1x3x128xf32>
    %79 = vector.shape_cast %78 : vector<1x3x128xf32> to vector<3x128xf32>
    %c0_42 = arith.constant 0 : index
    %c0_43 = arith.constant 0 : index
    %c512_44 = arith.constant 512 : index
    %80 = vector.load %arg4[%c0_42, %c0_43, %c512_44] : memref<1x3x1024xf32, #tpu.memory_space<vmem>>, vector<1x3x128xf32>
    %81 = vector.shape_cast %80 : vector<1x3x128xf32> to vector<3x128xf32>
    %82 = vector.broadcast %77 : vector<1x128xf32> to vector<3x128xf32>
    %83 = arith.mulf %82, %81 : vector<3x128xf32>
    %84 = arith.addf %67, %83 : vector<3x128xf32>
    %85 = arith.mulf %79, %81 : vector<3x128xf32>
    %86 = arith.addf %69, %85 : vector<3x128xf32>
    %87 = arith.mulf %81, %81 : vector<3x128xf32>
    %88 = arith.addf %71, %87 : vector<3x128xf32>
    %89 = arith.mulf %77, %77 : vector<1x128xf32>
    %90 = arith.addf %73, %89 : vector<1x128xf32>
    %91 = arith.mulf %79, %79 : vector<3x128xf32>
    %92 = arith.addf %75, %91 : vector<3x128xf32>
    %c0_45 = arith.constant 0 : index
    %c0_46 = arith.constant 0 : index
    %c640 = arith.constant 640 : index
    %93 = vector.load %arg2[%c0_45, %c0_46, %c640] : memref<1x1x1024xf32, #tpu.memory_space<vmem>>, vector<1x1x128xf32>
    %94 = vector.shape_cast %93 : vector<1x1x128xf32> to vector<1x128xf32>
    %c0_47 = arith.constant 0 : index
    %c0_48 = arith.constant 0 : index
    %c640_49 = arith.constant 640 : index
    %95 = vector.load %arg3[%c0_47, %c0_48, %c640_49] : memref<1x3x1024xf32, #tpu.memory_space<vmem>>, vector<1x3x128xf32>
    %96 = vector.shape_cast %95 : vector<1x3x128xf32> to vector<3x128xf32>
    %c0_50 = arith.constant 0 : index
    %c0_51 = arith.constant 0 : index
    %c640_52 = arith.constant 640 : index
    %97 = vector.load %arg4[%c0_50, %c0_51, %c640_52] : memref<1x3x1024xf32, #tpu.memory_space<vmem>>, vector<1x3x128xf32>
    %98 = vector.shape_cast %97 : vector<1x3x128xf32> to vector<3x128xf32>
    %99 = vector.broadcast %94 : vector<1x128xf32> to vector<3x128xf32>
    %100 = arith.mulf %99, %98 : vector<3x128xf32>
    %101 = arith.addf %84, %100 : vector<3x128xf32>
    %102 = arith.mulf %96, %98 : vector<3x128xf32>
    %103 = arith.addf %86, %102 : vector<3x128xf32>
    %104 = arith.mulf %98, %98 : vector<3x128xf32>
    %105 = arith.addf %88, %104 : vector<3x128xf32>
    %106 = arith.mulf %94, %94 : vector<1x128xf32>
    %107 = arith.addf %90, %106 : vector<1x128xf32>
    %108 = arith.mulf %96, %96 : vector<3x128xf32>
    %109 = arith.addf %92, %108 : vector<3x128xf32>
    %c0_53 = arith.constant 0 : index
    %c0_54 = arith.constant 0 : index
    %c768 = arith.constant 768 : index
    %110 = vector.load %arg2[%c0_53, %c0_54, %c768] : memref<1x1x1024xf32, #tpu.memory_space<vmem>>, vector<1x1x128xf32>
    %111 = vector.shape_cast %110 : vector<1x1x128xf32> to vector<1x128xf32>
    %c0_55 = arith.constant 0 : index
    %c0_56 = arith.constant 0 : index
    %c768_57 = arith.constant 768 : index
    %112 = vector.load %arg3[%c0_55, %c0_56, %c768_57] : memref<1x3x1024xf32, #tpu.memory_space<vmem>>, vector<1x3x128xf32>
    %113 = vector.shape_cast %112 : vector<1x3x128xf32> to vector<3x128xf32>
    %c0_58 = arith.constant 0 : index
    %c0_59 = arith.constant 0 : index
    %c768_60 = arith.constant 768 : index
    %114 = vector.load %arg4[%c0_58, %c0_59, %c768_60] : memref<1x3x1024xf32, #tpu.memory_space<vmem>>, vector<1x3x128xf32>
    %115 = vector.shape_cast %114 : vector<1x3x128xf32> to vector<3x128xf32>
    %116 = vector.broadcast %111 : vector<1x128xf32> to vector<3x128xf32>
    %117 = arith.mulf %116, %115 : vector<3x128xf32>
    %118 = arith.addf %101, %117 : vector<3x128xf32>
    %119 = arith.mulf %113, %115 : vector<3x128xf32>
    %120 = arith.addf %103, %119 : vector<3x128xf32>
    %121 = arith.mulf %115, %115 : vector<3x128xf32>
    %122 = arith.addf %105, %121 : vector<3x128xf32>
    %123 = arith.mulf %111, %111 : vector<1x128xf32>
    %124 = arith.addf %107, %123 : vector<1x128xf32>
    %125 = arith.mulf %113, %113 : vector<3x128xf32>
    %126 = arith.addf %109, %125 : vector<3x128xf32>
    %c0_61 = arith.constant 0 : index
    %c0_62 = arith.constant 0 : index
    %c896 = arith.constant 896 : index
    %127 = vector.load %arg2[%c0_61, %c0_62, %c896] : memref<1x1x1024xf32, #tpu.memory_space<vmem>>, vector<1x1x128xf32>
    %128 = vector.shape_cast %127 : vector<1x1x128xf32> to vector<1x128xf32>
    %c0_63 = arith.constant 0 : index
    %c0_64 = arith.constant 0 : index
    %c896_65 = arith.constant 896 : index
    %129 = vector.load %arg3[%c0_63, %c0_64, %c896_65] : memref<1x3x1024xf32, #tpu.memory_space<vmem>>, vector<1x3x128xf32>
    %130 = vector.shape_cast %129 : vector<1x3x128xf32> to vector<3x128xf32>
    %c0_66 = arith.constant 0 : index
    %c0_67 = arith.constant 0 : index
    %c896_68 = arith.constant 896 : index
    %131 = vector.load %arg4[%c0_66, %c0_67, %c896_68] : memref<1x3x1024xf32, #tpu.memory_space<vmem>>, vector<1x3x128xf32>
    %132 = vector.shape_cast %131 : vector<1x3x128xf32> to vector<3x128xf32>
    %133 = vector.broadcast %128 : vector<1x128xf32> to vector<3x128xf32>
    %134 = arith.mulf %133, %132 : vector<3x128xf32>
    %135 = arith.addf %118, %134 : vector<3x128xf32>
    %136 = arith.mulf %130, %132 : vector<3x128xf32>
    %137 = arith.addf %120, %136 : vector<3x128xf32>
    %138 = arith.mulf %132, %132 : vector<3x128xf32>
    %139 = arith.addf %122, %138 : vector<3x128xf32>
    %140 = arith.mulf %128, %128 : vector<1x128xf32>
    %141 = arith.addf %124, %140 : vector<1x128xf32>
    %142 = arith.mulf %130, %130 : vector<3x128xf32>
    %143 = arith.addf %126, %142 : vector<3x128xf32>
    %c0_69 = arith.constant 0 : index
    %c0_70 = arith.constant 0 : index
    %144 = vector.load %arg9[%c0_69, %c0_70] : memref<3x128xf32, #tpu.memory_space<vmem>>, vector<3x128xf32>
    %145 = arith.addf %144, %135 : vector<3x128xf32>
    %c0_71 = arith.constant 0 : index
    %c0_72 = arith.constant 0 : index
    %146 = vector.load %arg9[%c0_71, %c0_72] : memref<3x128xf32, #tpu.memory_space<vmem>>, vector<3x128xf32>
    tpu.vector_store %arg9[%c0_71, %c0_72], %145 {strides = array<i32>} : memref<3x128xf32, #tpu.memory_space<vmem>>, vector<3x128xf32>,
    %c0_73 = arith.constant 0 : index
    %c0_74 = arith.constant 0 : index
    %147 = vector.load %arg10[%c0_73, %c0_74] : memref<3x128xf32, #tpu.memory_space<vmem>>, vector<3x128xf32>
    %148 = arith.addf %147, %137 : vector<3x128xf32>
    %c0_75 = arith.constant 0 : index
    %c0_76 = arith.constant 0 : index
    %149 = vector.load %arg10[%c0_75, %c0_76] : memref<3x128xf32, #tpu.memory_space<vmem>>, vector<3x128xf32>
    tpu.vector_store %arg10[%c0_75, %c0_76], %148 {strides = array<i32>} : memref<3x128xf32, #tpu.memory_space<vmem>>, vector<3x128xf32>,
    %c0_77 = arith.constant 0 : index
    %c0_78 = arith.constant 0 : index
    %150 = vector.load %arg11[%c0_77, %c0_78] : memref<3x128xf32, #tpu.memory_space<vmem>>, vector<3x128xf32>
    %151 = arith.addf %150, %139 : vector<3x128xf32>
    %c0_79 = arith.constant 0 : index
    %c0_80 = arith.constant 0 : index
    %152 = vector.load %arg11[%c0_79, %c0_80] : memref<3x128xf32, #tpu.memory_space<vmem>>, vector<3x128xf32>
    tpu.vector_store %arg11[%c0_79, %c0_80], %151 {strides = array<i32>} : memref<3x128xf32, #tpu.memory_space<vmem>>, vector<3x128xf32>,
    %c0_81 = arith.constant 0 : index
    %c0_82 = arith.constant 0 : index
    %153 = vector.load %arg12[%c0_81, %c0_82] : memref<1x128xf32, #tpu.memory_space<vmem>>, vector<1x128xf32>
    %154 = arith.addf %153, %141 : vector<1x128xf32>
    %c0_83 = arith.constant 0 : index
    %c0_84 = arith.constant 0 : index
    %155 = vector.load %arg12[%c0_83, %c0_84] : memref<1x128xf32, #tpu.memory_space<vmem>>, vector<1x128xf32>
    tpu.vector_store %arg12[%c0_83, %c0_84], %154 {strides = array<i32>} : memref<1x128xf32, #tpu.memory_space<vmem>>, vector<1x128xf32>,
    %c0_85 = arith.constant 0 : index
    %c0_86 = arith.constant 0 : index
    %156 = vector.load %arg13[%c0_85, %c0_86] : memref<3x128xf32, #tpu.memory_space<vmem>>, vector<3x128xf32>
    %157 = arith.addf %156, %143 : vector<3x128xf32>
    %c0_87 = arith.constant 0 : index
    %c0_88 = arith.constant 0 : index
    %158 = vector.load %arg13[%c0_87, %c0_88] : memref<3x128xf32, #tpu.memory_space<vmem>>, vector<3x128xf32>
    tpu.vector_store %arg13[%c0_87, %c0_88], %157 {strides = array<i32>} : memref<3x128xf32, #tpu.memory_space<vmem>>, vector<3x128xf32>,
    %c0_i32_89 = arith.constant 0 : i32
    %159 = arith.cmpi eq, %arg1, %c0_i32_89 : i32
    %160 = arith.extui %159 : i1 to i32
    %c0_i32_90 = arith.constant 0 : i32
    %161 = arith.cmpi ne, %160, %c0_i32_90 : i32
    scf.if %161 {
      %c0_91 = arith.constant 0 : index
      %c0_92 = arith.constant 0 : index
      %162 = vector.load %arg9[%c0_91, %c0_92] : memref<3x128xf32, #tpu.memory_space<vmem>>, vector<3x128xf32>
      %cst_93 = arith.constant dense<0.000000e+00> : vector<3xf32>
      %163 = vector.multi_reduction <add>, %162, %cst_93 [1] : vector<3x128xf32> to vector<3xf32>
      %164 = vector.shape_cast %163 : vector<3xf32> to vector<3x1xf32>
      %c0_94 = arith.constant 0 : index
      %c0_95 = arith.constant 0 : index
      %165 = vector.load %arg10[%c0_94, %c0_95] : memref<3x128xf32, #tpu.memory_space<vmem>>, vector<3x128xf32>
      %cst_96 = arith.constant dense<0.000000e+00> : vector<3xf32>
      %166 = vector.multi_reduction <add>, %165, %cst_96 [1] : vector<3x128xf32> to vector<3xf32>
      %167 = vector.shape_cast %166 : vector<3xf32> to vector<3x1xf32>
      %c0_97 = arith.constant 0 : index
      %c0_98 = arith.constant 0 : index
      %168 = vector.load %arg11[%c0_97, %c0_98] : memref<3x128xf32, #tpu.memory_space<vmem>>, vector<3x128xf32>
      %cst_99 = arith.constant dense<0.000000e+00> : vector<3xf32>
      %169 = vector.multi_reduction <add>, %168, %cst_99 [1] : vector<3x128xf32> to vector<3xf32>
      %170 = vector.shape_cast %169 : vector<3xf32> to vector<3x1xf32>
      %c0_100 = arith.constant 0 : index
      %c0_101 = arith.constant 0 : index
      %171 = vector.load %arg12[%c0_100, %c0_101] : memref<1x128xf32, #tpu.memory_space<vmem>>, vector<1x128xf32>
      %cst_102 = arith.constant dense<0.000000e+00> : vector<1xf32>
      %172 = vector.multi_reduction <add>, %171, %cst_102 [1] : vector<1x128xf32> to vector<1xf32>
      %173 = vector.shape_cast %172 : vector<1xf32> to vector<1x1xf32>
      %c0_103 = arith.constant 0 : index
      %c0_104 = arith.constant 0 : index
      %174 = vector.load %arg13[%c0_103, %c0_104] : memref<3x128xf32, #tpu.memory_space<vmem>>, vector<3x128xf32>
      %cst_105 = arith.constant dense<0.000000e+00> : vector<3xf32>
      %175 = vector.multi_reduction <add>, %174, %cst_105 [1] : vector<3x128xf32> to vector<3xf32>
      %176 = vector.shape_cast %175 : vector<3xf32> to vector<3x1xf32>
      %cst_106 = arith.constant 9.99999996E-13 : f32
      %177 = vector.broadcast %cst_106 : f32 to vector<3x1xf32>
      %178 = arith.addf %170, %177 : vector<3x1xf32>
      %179 = arith.divf %164, %178 : vector<3x1xf32>
      %180 = arith.mulf %179, %179 : vector<3x1xf32>
      %181 = arith.mulf %180, %170 : vector<3x1xf32>
      %cst_107 = arith.constant 9.99999996E-13 : f32
      %182 = vector.broadcast %cst_107 : f32 to vector<3x1xf32>
      %183 = arith.addf %181, %182 : vector<3x1xf32>
      %cst_108 = arith.constant 2.000000e+00 : f32
      %184 = vector.broadcast %cst_108 : f32 to vector<3x1xf32>
      %185 = arith.mulf %184, %179 : vector<3x1xf32>
      %186 = arith.mulf %185, %164 : vector<3x1xf32>
      %187 = arith.subf %181, %186 : vector<3x1xf32>
      %188 = vector.broadcast %173 : vector<1x1xf32> to vector<3x1xf32>
      %189 = arith.addf %187, %188 : vector<3x1xf32>
      %cst_109 = arith.constant 9.99999996E-13 : f32
      %190 = vector.broadcast %cst_109 : f32 to vector<3x1xf32>
      %191 = arith.addf %189, %190 : vector<3x1xf32>
      %192 = arith.divf %183, %191 : vector<3x1xf32>
      %193 = math.log %192 : vector<3x1xf32>
      %cst_110 = arith.constant 4.34294462 : f32
      %194 = vector.broadcast %cst_110 : f32 to vector<3x1xf32>
      %195 = arith.mulf %194, %193 : vector<3x1xf32>
      %196 = vector.shape_cast %195 : vector<3x1xf32> to vector<1x3x1xf32>
      %c0_111 = arith.constant 0 : index
      %c0_112 = arith.constant 0 : index
      %c0_113 = arith.constant 0 : index
      %197 = vector.load %arg5[%c0_111, %c0_112, %c0_113] : memref<1x3x1xf32, #tpu.memory_space<vmem>>, vector<1x3x1xf32>
      tpu.vector_store %arg5[%c0_111, %c0_112, %c0_113], %196 {strides = array<i32>} : memref<1x3x1xf32, #tpu.memory_space<vmem>>, vector<1x3x1xf32>,
      %cst_114 = arith.constant 9.99999996E-13 : f32
      %198 = vector.broadcast %cst_114 : f32 to vector<3x1xf32>
      %199 = arith.addf %170, %198 : vector<3x1xf32>
      %cst_115 = arith.constant 2.000000e+00 : f32
      %200 = vector.broadcast %cst_115 : f32 to vector<3x1xf32>
      %201 = arith.mulf %200, %164 : vector<3x1xf32>
      %202 = arith.subf %170, %201 : vector<3x1xf32>
      %203 = vector.broadcast %173 : vector<1x1xf32> to vector<3x1xf32>
      %204 = arith.addf %202, %203 : vector<3x1xf32>
      %cst_116 = arith.constant 9.99999996E-13 : f32
      %205 = vector.broadcast %cst_116 : f32 to vector<3x1xf32>
      %206 = arith.addf %204, %205 : vector<3x1xf32>
      %207 = arith.divf %199, %206 : vector<3x1xf32>
      %208 = math.log %207 : vector<3x1xf32>
      %cst_117 = arith.constant 4.34294462 : f32
      %209 = vector.broadcast %cst_117 : f32 to vector<3x1xf32>
      %210 = arith.mulf %209, %208 : vector<3x1xf32>
      %211 = vector.shape_cast %210 : vector<3x1xf32> to vector<1x3x1xf32>
      %c0_118 = arith.constant 0 : index
      %c0_119 = arith.constant 0 : index
      %c0_120 = arith.constant 0 : index
      %212 = vector.load %arg6[%c0_118, %c0_119, %c0_120] : memref<1x3x1xf32, #tpu.memory_space<vmem>>, vector<1x3x1xf32>
      tpu.vector_store %arg6[%c0_118, %c0_119, %c0_120], %211 {strides = array<i32>} : memref<1x3x1xf32, #tpu.memory_space<vmem>>, vector<1x3x1xf32>,
      %cst_121 = arith.constant 9.99999996E-13 : f32
      %213 = vector.broadcast %cst_121 : f32 to vector<3x1xf32>
      %214 = arith.addf %170, %213 : vector<3x1xf32>
      %215 = arith.divf %167, %214 : vector<3x1xf32>
      %216 = arith.mulf %215, %215 : vector<3x1xf32>
      %217 = arith.mulf %216, %170 : vector<3x1xf32>
      %cst_122 = arith.constant 9.99999996E-13 : f32
      %218 = vector.broadcast %cst_122 : f32 to vector<3x1xf32>
      %219 = arith.addf %217, %218 : vector<3x1xf32>
      %cst_123 = arith.constant 2.000000e+00 : f32
      %220 = vector.broadcast %cst_123 : f32 to vector<3x1xf32>
      %221 = arith.mulf %220, %215 : vector<3x1xf32>
      %222 = arith.mulf %221, %167 : vector<3x1xf32>
      %223 = arith.subf %217, %222 : vector<3x1xf32>
      %224 = arith.addf %223, %176 : vector<3x1xf32>
      %cst_124 = arith.constant 9.99999996E-13 : f32
      %225 = vector.broadcast %cst_124 : f32 to vector<3x1xf32>
      %226 = arith.addf %224, %225 : vector<3x1xf32>
      %227 = arith.divf %219, %226 : vector<3x1xf32>
      %228 = math.log %227 : vector<3x1xf32>
      %cst_125 = arith.constant 4.34294462 : f32
      %229 = vector.broadcast %cst_125 : f32 to vector<3x1xf32>
      %230 = arith.mulf %229, %228 : vector<3x1xf32>
      %231 = vector.shape_cast %230 : vector<3x1xf32> to vector<1x3x1xf32>
      %c0_126 = arith.constant 0 : index
      %c0_127 = arith.constant 0 : index
      %c0_128 = arith.constant 0 : index
      %232 = vector.load %arg7[%c0_126, %c0_127, %c0_128] : memref<1x3x1xf32, #tpu.memory_space<vmem>>, vector<1x3x1xf32>
      tpu.vector_store %arg7[%c0_126, %c0_127, %c0_128], %231 {strides = array<i32>} : memref<1x3x1xf32, #tpu.memory_space<vmem>>, vector<1x3x1xf32>,
      %cst_129 = arith.constant 9.99999996E-13 : f32
      %233 = vector.broadcast %cst_129 : f32 to vector<3x1xf32>
      %234 = arith.addf %170, %233 : vector<3x1xf32>
      %cst_130 = arith.constant 2.000000e+00 : f32
      %235 = vector.broadcast %cst_130 : f32 to vector<3x1xf32>
      %236 = arith.mulf %235, %167 : vector<3x1xf32>
      %237 = arith.subf %170, %236 : vector<3x1xf32>
      %238 = arith.addf %237, %176 : vector<3x1xf32>
      %cst_131 = arith.constant 9.99999996E-13 : f32
      %239 = vector.broadcast %cst_131 : f32 to vector<3x1xf32>
      %240 = arith.addf %238, %239 : vector<3x1xf32>
      %241 = arith.divf %234, %240 : vector<3x1xf32>
      %242 = math.log %241 : vector<3x1xf32>
      %cst_132 = arith.constant 4.34294462 : f32
      %243 = vector.broadcast %cst_132 : f32 to vector<3x1xf32>
      %244 = arith.mulf %243, %242 : vector<3x1xf32>
      %245 = vector.shape_cast %244 : vector<3x1xf32> to vector<1x3x1xf32>
      %c0_133 = arith.constant 0 : index
      %c0_134 = arith.constant 0 : index
      %c0_135 = arith.constant 0 : index
      %246 = vector.load %arg8[%c0_133, %c0_134, %c0_135] : memref<1x3x1xf32, #tpu.memory_space<vmem>>, vector<1x3x1xf32>
      tpu.vector_store %arg8[%c0_133, %c0_134, %c0_135], %245 {strides = array<i32>} : memref<1x3x1xf32, #tpu.memory_space<vmem>>, vector<1x3x1xf32>,
    } else {
    }
    return
  }
  func.func @transform_0(%arg0: i32, %arg1: i32) -> (i32, i32, i32) {
    %c0_i32 = arith.constant 0 : i32
    %c0_i32_0 = arith.constant 0 : i32
    return %arg0, %c0_i32, %arg1 : i32, i32, i32
  }
  func.func @transform_1(%arg0: i32, %arg1: i32) -> (i32, i32, i32) {
    %c0_i32 = arith.constant 0 : i32
    %c0_i32_0 = arith.constant 0 : i32
    return %arg0, %c0_i32, %arg1 : i32, i32, i32
  }
  func.func @transform_2(%arg0: i32, %arg1: i32) -> (i32, i32, i32) {
    %c0_i32 = arith.constant 0 : i32
    %c0_i32_0 = arith.constant 0 : i32
    return %arg0, %c0_i32, %arg1 : i32, i32, i32
  }
  func.func @transform_3(%arg0: i32, %arg1: i32) -> (i32, i32, i32) {
    %c0_i32 = arith.constant 0 : i32
    %c0_i32_0 = arith.constant 0 : i32
    %c0_i32_1 = arith.constant 0 : i32
    return %arg0, %c0_i32, %c0_i32_0 : i32, i32, i32
  }
  func.func @transform_4(%arg0: i32, %arg1: i32) -> (i32, i32, i32) {
    %c0_i32 = arith.constant 0 : i32
    %c0_i32_0 = arith.constant 0 : i32
    %c0_i32_1 = arith.constant 0 : i32
    return %arg0, %c0_i32, %c0_i32_0 : i32, i32, i32
  }
  func.func @transform_5(%arg0: i32, %arg1: i32) -> (i32, i32, i32) {
    %c0_i32 = arith.constant 0 : i32
    %c0_i32_0 = arith.constant 0 : i32
    %c0_i32_1 = arith.constant 0 : i32
    return %arg0, %c0_i32, %c0_i32_0 : i32, i32, i32
  }
  func.func @transform_6(%arg0: i32, %arg1: i32) -> (i32, i32, i32) {
    %c0_i32 = arith.constant 0 : i32
    %c0_i32_0 = arith.constant 0 : i32
    %c0_i32_1 = arith.constant 0 : i32
    return %arg0, %c0_i32, %c0_i32_0 : i32, i32, i32
  }
}

</mosaic_0001>

<bundles_post_ra>
// kernel: tpu_custom_call.1
= control target key start
LH: loop header
LB: loop body
LE: loop exit
PB: predicated region body
PF: predicated region fallthrough
CT: control target
= control target key end

     0   :  { %s950_s21 = smov 0   ;;  %s952_s22 = smov 0   ;;  %s1091_s0 = inlined_call_operand.vmem [shape: f32[2,1,1024], index: 0, kind: input, shape index: {}]   ;;  %s1092_s1 = inlined_call_operand.vmem [shape: f32[2,3,1024], index: 1, kind: input, shape index: {}]   ;;  %s1093_s2 = inlined_call_operand.vmem [shape: f32[2,3,1024], index: 2, kind: input, shape index: {}]   ;;  %s1094_s3 = inlined_call_operand.vmem [shape: f32[2,3,1], index: 3, kind: output, shape index: {0}]   ;;  %s1095_s4 = inlined_call_operand.vmem [shape: f32[2,3,1], index: 4, kind: output, shape index: {1}]   ;;  %s1096_s5 = inlined_call_operand.vmem [shape: f32[2,3,1], index: 5, kind: output, shape index: {2}]   ;;  %s1097_s6 = inlined_call_operand.vmem [shape: f32[2,3,1], index: 6, kind: output, shape index: {3}]  }
   0x1   :  { %s954_s23 = smov 0  }
   0x2 LB: > { %s29_s24 = sadd.s32 1, %s908_s22  ;;  %p833_p0 = scmp.ge.s32.totalorder %s912_s23, 1  ;;  %s912_s23 = sphi %s954_s23, %s17_s23   ;;  %s908_s22 = sphi %s952_s22, %s1099_s22   ;;  %s904_s21 = sphi %s950_s21, %s1098_s21  }
   0x3   : > { %p31_p1 = scmp.ge.s32.totalorder %s29_s24, 2  ;;  %p271_p2 = scmp.lt.s32.totalorder %s912_s23, 3 }
   0x5   : > { %s1101_s24 = smov (%p31_p1, %s29_s24), 0  ;;  %p272_p3 = pnand %p833_p0, %p271_p2 }
   0x6   : > { %p334_p4 = scmp.lt.s32.totalorder (!%p272_p3), %s904_s21, 1  ;;  %v391_v0 = vlaneseq (!%p272_p3)  ;;  %v914_v1 = vmov (!%p272_p3), 0.0   ;;  %vm558_vm0 = vcmask (!%p272_p3), 1042432   ;;  %vm571_vm1 = vcmask (!%p272_p3), 1040384  }
   0x7   : > { %275 = sbr.rel (%p272_p3) target bundleno = 242 (0xf2), region = 32  ;;  %384 = vst [vmem:[#allocation4] sm:$0x7] (!%p272_p3), %v914_v1  ;;  %382 = vst [vmem:[#allocation2] sm:$0x7] (!%p272_p3), %v914_v1  ;;  %vm599_vm2 = vcmask (!%p272_p3), 2048  }
   0x8   : > { %383 = vst [vmem:[#allocation3] sm:$0x7] (!%p272_p3), %v914_v1  ;;  %385 = vst [vmem:[#allocation5] sm:$0x1] (!%p272_p3), %v914_v1  ;;  %v392_v2 = vshrl.u32 (!%p272_p3), %v391_v0, 7 }
   0x9   : > { %386 = vst [vmem:[#allocation6] sm:$0x7] (!%p272_p3), %v914_v1 }
   0xa   : > { %v982_v11 = vsub.s32 (!%p272_p3), 0, %v392_v2 }
   0xe   : > { %s1103_s21 = smov (!%p334_p4, %s904_s21), 1 }
   0xf   : > { %s845_s25 = sshll.u32 %s1103_s21, 5  ;;  %s834_s29 = sshll.u32 %s1103_s21, 3 }
  0x10   : > { %s360_s28 = scalar_lea.vmem %s1093_s2, %s845_s25  ;;  %s978_s8 = scalar_lea.vmem %s1092_s1, %s845_s25 }
  0x11   : > { %v389_v3 = vld [vmem:[%s360_s28] sm:$0x7]  ;;  %v408_v4 = vld [vmem:[%s360_s28 + $0x4] sm:$0x7]  ;;  %v427_v5 = vld [vmem:[%s360_s28 + $0x8] sm:$0x7]  ;;  %s998_s11 = scalar_lea.vmem %s1091_s0, %s834_s29 }
  0x12   : > { %v400_v6 = vmul.f32 %v389_v3, %v389_v3  ;;  %v419_v7 = vmul.f32 %v408_v4, %v408_v4  ;;  %v438_v8 = vmul.f32 %v427_v5, %v427_v5  ;;  %v446_v9 = vld [vmem:[%s360_s28 + $0xc] sm:$0x7]  ;;  %v980_v10 = vld [vmem:[%s360_s28 + $0x10] sm:$0x7]  ;;  %v984_v12 = vld [vmem:[%s360_s28 + $0x14] sm:$0x7] }
  0x13   : > { %v986_v13 = vld [vmem:[%s360_s28 + $0x18] sm:$0x7]  ;;  %v988_v14 = vld [vmem:[%s360_s28 + $0x1c] sm:$0x7]  ;;  %v457_v16 = vmul.f32 %v446_v9, %v446_v9  ;;  %v388_v17 = vld [vmem:[%s978_s8] sm:$0x7]  ;;  %v476_v20 = vmul.f32 %v980_v10, %v980_v10  ;;  %v495_v27 = vmul.f32 %v984_v12, %v984_v12 }
  0x14   : > { %v420_v15 = vadd.f32 %v419_v7, %v400_v6  ;;  %v407_v18 = vld [vmem:[%s978_s8 + $0x4] sm:$0x7]  ;;  %v993_v19 = vld [vmem:[%s978_s8 + $0x8] sm:$0x7]  ;;  %v398_v21 = vmul.f32 %v389_v3, %v388_v17  ;;  %v1004_v24 = vld [vmem:[%s978_s8 + $0xc] sm:$0x7]  ;;  %v514_v28 = vmul.f32 %v986_v13, %v986_v13  ;;  %v533_v29 = vmul.f32 %v988_v14, %v988_v14 }
  0x15   : > { %v417_v22 = vmul.f32 %v408_v4, %v407_v18  ;;  %v436_v23 = vmul.f32 %v427_v5, %v993_v19  ;;  %v1007_v25 = vld [vmem:[%s978_s8 + $0x10] sm:$0x7]  ;;  %v1016_v30 = vld [vmem:[%s978_s8 + $0x14] sm:$0x7]  ;;  %v1019_v31 = vld [vmem:[%s978_s8 + $0x18] sm:$0x7]  ;;  %v455_v33 = vmul.f32 %v446_v9, %v1004_v24  ;;  %v404_v38 = vmul.f32 %v388_v17, %v388_v17 }
  0x16   : > { %v439_v26 = vadd.f32 %v438_v8, %v420_v15  ;;  %v474_v34 = vmul.f32 %v980_v10, %v1007_v25  ;;  %v387_v35 = vld [vmem:[%s998_s11] sm:$0x1]  ;;  %v406_v36 = vld [vmem:[%s998_s11 + $0x1] sm:$0x1]  ;;  %v425_v37 = vld [vmem:[%s998_s11 + $0x2] sm:$0x1]  ;;  %v493_v47 = vmul.f32 %v984_v12, %v1016_v30  ;;  %v512_v56 = vmul.f32 %v986_v13, %v1019_v31 }
  0x17   : > { %v418_v32 = vadd.f32 %v417_v22, %v398_v21  ;;  %v394_v40 = vrot.slane %v387_v35, %v982_v11  ;;  %v413_v41 = vrot.slane %v406_v36, %v982_v11  ;;  %v432_v42 = vrot.slane %v425_v37, %v982_v11  ;;  %v444_v43 = vld [vmem:[%s998_s11 + $0x3] sm:$0x1]  ;;  %v463_v44 = vld [vmem:[%s998_s11 + $0x4] sm:$0x1]  ;;  %v482_v45 = vld [vmem:[%s998_s11 + $0x5] sm:$0x1] }
  0x18   : > { %v458_v39 = vadd.f32 %v457_v16, %v439_v26  ;;  %v451_v48 = vrot.slane %v444_v43, %v982_v11  ;;  %v470_v49 = vrot.slane %v463_v44, %v982_v11  ;;  %v501_v50 = vld [vmem:[%s998_s11 + $0x6] sm:$0x1]  ;;  %v521_v57 = vld [vmem:[%s978_s8 + $0x1c] sm:$0x7]  ;;  %v489_v58 = vrot.slane %v482_v45, %v982_v11  ;;  %v520_v1 = vld [vmem:[%s998_s11 + $0x7] sm:$0x1] }
  0x19   : > { %v437_v46 = vadd.f32 %v436_v23, %v418_v32  ;;  %v396_v52 = vmul.f32 %v394_v40, %v389_v3  ;;  %v415_v53 = vmul.f32 %v413_v41, %v408_v4  ;;  %v434_v54 = vmul.f32 %v432_v42, %v427_v5  ;;  %v545_v15 = vld [vmem:[#allocation4] sm:$0x7]  ;;  %s839_s12 = sshll.u32 %s1103_s21, 2 }
  0x1a   : > { %v477_v51 = vadd.f32 %v476_v20, %v458_v39  ;;  %v423_v59 = vmul.f32 %v407_v18, %v407_v18  ;;  %v453_v62 = vmul.f32 %v451_v48, %v446_v9  ;;  %v508_v63 = vrot.slane %v501_v50, %v982_v11  ;;  %s369_s15 = scalar_lea.vmem %s1095_s4, %s839_s12  ;;  %s377_s18 = scalar_lea.vmem %s1097_s6, %s839_s12 }
  0x1b   : > { %v456_v55 = vadd.f32 %v455_v33, %v437_v46  ;;  %v416_v61 = vadd.f32 %v415_v53, %v396_v52  ;;  %v402_v2 = vmul.f32 %v387_v35, %v387_v35  ;;  %v421_v6 = vmul.f32 %v406_v36, %v406_v36  ;;  %v548_v52 = vld [vmem:[#allocation5] sm:$0x1]  ;;  %s365_s21 = scalar_lea.vmem %s1094_s3, %s839_s12  ;;  %s373_s27 = scalar_lea.vmem %s1096_s5, %s839_s12 }
  0x1c   : > { %v496_v60 = vadd.f32 %v495_v27, %v477_v51  ;;  %v440_v3 = vmul.f32 %v425_v37, %v425_v37  ;;  %v531_v5 = vmul.f32 %v988_v14, %v521_v57  ;;  %v472_v8 = vmul.f32 %v470_v49, %v980_v10 }
  0x1d   : > { %v475_v0 = vadd.f32 %v474_v34, %v456_v55  ;;  %v435_v7 = vadd.f32 %v434_v54, %v416_v61  ;;  %v491_v17 = vmul.f32 %v489_v58, %v984_v12  ;;  %v422_v18 = vadd.f32 %v421_v6, %v402_v2  ;;  %v542_v34 = vld [vmem:[#allocation3] sm:$0x7] }
  0x1e   : > { %v515_v4 = vadd.f32 %v514_v28, %v496_v60  ;;  %v459_v20 = vmul.f32 %v444_v43, %v444_v43  ;;  %v510_v22 = vmul.f32 %v508_v63, %v986_v13  ;;  %v527_v23 = vrot.slane %v520_v1, %v982_v11 }
  0x1f   : > { %v494_v16 = vadd.f32 %v493_v47, %v475_v0  ;;  %v454_v21 = vadd.f32 %v453_v62, %v435_v7  ;;  %v441_v27 = vadd.f32 %v440_v3, %v422_v18  ;;  %v478_v28 = vmul.f32 %v463_v44, %v463_v44 }
  0x20   : > { %v534_v9 = vadd.f32 %v533_v29, %v515_v4  ;;  %v424_v32 = vadd.f32 %v423_v59, %v404_v38  ;;  %v442_v10 = vmul.f32 %v993_v19, %v993_v19  ;;  %v461_v12 = vmul.f32 %v1004_v24, %v1004_v24  ;;  %v539_v24 = vld [vmem:[#allocation2] sm:$0x7]  ;;  %v551_v59 = vld [vmem:[#allocation6] sm:$0x7] }
  0x21   : > { %v513_v26 = vadd.f32 %v512_v56, %v494_v16  ;;  %v473_v35 = vadd.f32 %v472_v8, %v454_v21  ;;  %v460_v29 = vadd.f32 %v459_v20, %v441_v27  ;;  %v497_v37 = vmul.f32 %v482_v45, %v482_v45 }
  0x22   : > { %v546_v33 = vadd.f32 %v545_v15, %v534_v9  ;;  %v529_v39 = vmul.f32 %v527_v23, %v988_v14  ;;  %v443_v40 = vadd.f32 %v442_v10, %v424_v32  ;;  %v480_v38 = vmul.f32 %v1007_v25, %v1007_v25 }
  0x23   : > { %v532_v36 = vadd.f32 %v531_v5, %v513_v26  ;;  %v492_v13 = vadd.f32 %v491_v17, %v473_v35  ;;  %v479_v42 = vadd.f32 %v478_v28, %v460_v29  ;;  %v516_v43 = vmul.f32 %v501_v50, %v501_v50 }
  0x24   : > { %547 = vst [vmem:[#allocation4] sm:$0x7] %v546_v33  ;;  %v462_v46 = vadd.f32 %v461_v12, %v443_v40  ;;  %v499_v19 = vmul.f32 %v1016_v30, %v1016_v30  ;;  %v535_v45 = vmul.f32 %v520_v1, %v520_v1  ;;  %v518_v14 = vmul.f32 %v1019_v31, %v1019_v31 }
  0x25   : > { %v543_v41 = vadd.f32 %v542_v34, %v532_v36  ;;  %v511_v44 = vadd.f32 %v510_v22, %v492_v13  ;;  %v498_v47 = vadd.f32 %v497_v37, %v479_v42  ;;  %v537_v50 = vmul.f32 %v521_v57, %v521_v57 }
  0x26   : > { %v481_v49 = vadd.f32 %v480_v38, %v462_v46 }
  0x27   : > { %544 = vst [vmem:[#allocation3] sm:$0x7] %v543_v41  ;;  %v530_v48 = vadd.f32 %v529_v39, %v511_v44  ;;  %v517_v51 = vadd.f32 %v516_v43, %v498_v47 }
  0x28   : > { %v500_v53 = vadd.f32 %v499_v19, %v481_v49 }
  0x29   : > { %v540_v25 = vadd.f32 %v539_v24, %v530_v48  ;;  %v536_v55 = vadd.f32 %v535_v45, %v517_v51 }
  0x2a   : > { %v519_v30 = vadd.f32 %v518_v14, %v500_v53 }
  0x2b   : > { %v566_v54 = vld [vmem:[#allocation4] sm:$0x7]  ;;  %541 = vst [vmem:[#allocation2] sm:$0x7] %v540_v25  ;;  %v549_v58 = vadd.f32 %v548_v52, %v536_v55 }
  0x2c   : > { %v567_v56 = vsel %vm558_vm0, %v566_v54, 0.0  ;;  %v538_v61 = vadd.f32 %v537_v50, %v519_v30 }
  0x2d   : > { %568 = vadd.xlane.f32.xlu0 %v567_v56  ;;  %550 = vst [vmem:[#allocation5] sm:$0x1] %v549_v58 }
  0x2e   : > { %v562_v60 = vld [vmem:[#allocation3] sm:$0x7]  ;;  %v552_v31 = vadd.f32 %v551_v59, %v538_v61 }
  0x2f   : > { %v563_v62 = vsel %vm558_vm0, %v562_v60, 0.0 }
  0x30   : > { %564 = vadd.xlane.f32.xlu1 %v563_v62  ;;  %553 = vst [vmem:[#allocation6] sm:$0x7] %v552_v31 }
  0x32   : > { %v557_v63 = vld [vmem:[#allocation2] sm:$0x7] }
  0x33   : > { %v559_v57 = vsel %vm558_vm0, %v557_v63, 0.0 }
  0x34   : > { %560 = vadd.xlane.f32.xlu0 %v559_v57  ;;  %v570_v0 = vld [vmem:[#allocation5] sm:$0x1] }
  0x35   : > { %v572_v1 = vsel %vm571_vm1, %v570_v0, 0.0 }
  0x36   : > { %573 = vadd.xlane.f32.xlu1 %v572_v1 }
  0x37   : > { %v575_v2 = vld [vmem:[#allocation6] sm:$0x7] }
  0x38   : > { %v576_v6 = vsel %vm558_vm0, %v575_v2, 0.0 }
  0x39   : > { %577 = vadd.xlane.f32.xlu0 %v576_v6 }
  0xba   : > { %v569_v3 = vpop.xlane.xlu0 %568 }
  0xbb   : > { %v579_v4 = vadd.f32 1e-12, %v569_v3 }
  0xbd   : > { %872 = vrcp.f32 %v579_v4  ;;  %v565_v5 = vpop.xlane.xlu1 %564 }
  0xbe   : > { %v626_v8 = vmul.f32 2.0, %v565_v5 }
  0xc0   : > { %v627_v9 = vsub.f32 %v569_v3, %v626_v8 }
  0xc1   : > { %v561_v7 = vpop.xlane.xlu0 %560 }
  0xc2   : > { %v601_v15 = vmul.f32 2.0, %v561_v7 }
  0xc3   : > { %v574_v16 = vpop.xlane.xlu1 %573 }
  0xc4   : > { %v602_v17 = vsub.f32 %v569_v3, %v601_v15  ;;  %v591_v18 = vrot.slane %v574_v16, %v982_v11 }
  0xc6   : > { %v603_v23 = vadd.f32 %v602_v17, %v591_v18  ;;  %v578_v26 = vpop.xlane.xlu0 %577 }
  0xc7   : > { %v873_v20 = vpop.eup %872  ;;  %v628_v27 = vadd.f32 %v627_v9, %v578_v26 }
  0xc8   : > { %v611_v21 = vmul.f32 %v873_v20, %v565_v5  ;;  %v581_v22 = vmul.f32 %v873_v20, %v561_v7  ;;  %v604_v35 = vadd.f32 1e-12, %v603_v23 }
  0xc9   : > { %v629_v10 = vadd.f32 1e-12, %v628_v27 }
  0xca   : > { %v612_v28 = vmul.f32 %v611_v21, %v611_v21  ;;  %v615_v32 = vmul.f32 2.0, %v611_v21  ;;  %v582_v33 = vmul.f32 %v581_v22, %v581_v22  ;;  %v585_v34 = vmul.f32 2.0, %v581_v22 }
  0xcb   : > { %874 = vrcp.f32 %v604_v35 }
  0xcc   : > { %v616_v12 = vmul.f32 %v615_v32, %v565_v5  ;;  %v586_v36 = vmul.f32 %v585_v34, %v561_v7  ;;  %v583_v29 = vmul.f32 %v582_v33, %v569_v3  ;;  %v613_v37 = vmul.f32 %v612_v28, %v569_v3 }
  0xcd   : > { %876 = vrcp.f32 %v629_v10 }
  0xce   : > { %v587_v13 = vsub.f32 %v583_v29, %v586_v36  ;;  %v617_v11 = vsub.f32 %v613_v37, %v616_v12  ;;  %v584_v19 = vadd.f32 1e-12, %v583_v29  ;;  %v614_v47 = vadd.f32 1e-12, %v613_v37 }
  0xd0   : > { %v592_v39 = vadd.f32 %v591_v18, %v587_v13  ;;  %v618_v40 = vadd.f32 %v617_v11, %v578_v26 }
  0xd2   : > { %v593_v38 = vadd.f32 1e-12, %v592_v39  ;;  %v619_v41 = vadd.f32 1e-12, %v618_v40 }
  0xd4   : > { %878 = vrcp.f32 %v593_v38 }
  0xd5   : > { %880 = vrcp.f32 %v619_v41  ;;  %v875_v42 = vpop.eup %874 }
  0xd6   : > { %v606_v43 = vmul.f32 %v875_v42, %v579_v4 }
  0xd7   : > { %v877_v44 = vpop.eup %876 }
  0xd8   : > { %882 = vlog2.f32 %v606_v43  ;;  %v631_v46 = vmul.f32 %v877_v44, %v579_v4 }
  0xda   : > { %884 = vlog2.f32 %v631_v46 }
  0xde   : > { %v879_v24 = vpop.eup %878 }
  0xdf   : > { %v881_v45 = vpop.eup %880  ;;  %v595_v48 = vmul.f32 %v879_v24, %v584_v19 }
  0xe0   : > { %v621_v49 = vmul.f32 %v881_v45, %v614_v47 }
  0xe1   : > { %886 = vlog2.f32 %v595_v48 }
  0xe2   : > { %888 = vlog2.f32 %v621_v49  ;;  %v883_v14 = vpop.eup %882 }
  0xe3   : > { %v608_v51 = vmul.f32 0.6931472, %v883_v14 }
  0xe4   : > { %v885_v25 = vpop.eup %884 }
  0xe5   : > { %v609_v52 = vmul.f32 4.3429446, %v608_v51  ;;  %v633_v53 = vmul.f32 0.6931472, %v885_v25 }
  0xe7   : > { %610 = vst.msk [vmem:[%s369_s15] sm:$0x7] %vm599_vm2, %v609_v52  ;;  %v634_v50 = vmul.f32 4.3429446, %v633_v53 }
  0xe9   : > { %635 = vst.msk [vmem:[%s377_s18] sm:$0x7] %vm599_vm2, %v634_v50 }
  0xeb   : > { %v887_v54 = vpop.eup %886 }
  0xec   : > { %v889_v55 = vpop.eup %888  ;;  %v597_v56 = vmul.f32 0.6931472, %v887_v54 }
  0xed   : > { %v623_v30 = vmul.f32 0.6931472, %v889_v55 }
  0xee   : > { %v598_v58 = vmul.f32 4.3429446, %v597_v56 }
  0xef   : > { %v624_v59 = vmul.f32 4.3429446, %v623_v30 }
  0xf0   : > { %600 = vst.msk [vmem:[%s365_s21] sm:$0x7] %vm599_vm2, %v598_v58 }
  0xf1   : > { %625 = vst.msk [vmem:[%s373_s27] sm:$0x7] %vm599_vm2, %v624_v59 }
  0xf2 PF: > { %s17_s23 = sadd.s32 1, %s912_s23   ;;  %s1098_s21 = smov %s908_s22 }
  0xf3   : > { %p14_p5 = scmp.ge.s32.totalorder %s17_s23, 4   ;;  %s1099_s22 = smov %s1101_s24 }
  0xf5   :  { %16 = sbr.rel (!%p14_p5) target bundleno = 2 (0x2), region = 112 }

</bundles_post_ra>
